<compile_context>
chip_gen: v6e
topology: v6e:2x2x1
jax: 0.10.0
libtpu: 0.0.40
codegen_flags: <defaults>
</compile_context>

<pallas_src>
import functools
import math

import jax
import jax.numpy as jnp
from jax.experimental import pallas as pl
from jax.experimental.pallas import tpu as pltpu


def _label_smoothing_kernel(logits_ref, target_ref, row_loss_ref, *, eps, ignore_index):
    x = logits_ref[...].astype(jnp.float32)      # (TILE_N, C)
    tgt = target_ref[...]                        # (TILE_N, 1) int32
    c = x.shape[-1]

    # Compile-time smoothing constants.
    n_smooth = c - 1 if ignore_index > -1 else c
    smooth = eps / n_smooth
    conf = 1.0 - eps + smooth
    # Number of columns carrying `smooth` probability in a non-ignored row.
    n_smooth_cols = c - 2 if ignore_index > -1 else c - 1
    h_const = 0.0
    if smooth > 0.0:
        h_const += n_smooth_cols * smooth * math.log(smooth)
    if conf > 0.0:
        h_const += conf * math.log(conf)

    # log_softmax pieces: only row reductions, the full logp tile is never built.
    m = jnp.max(x, axis=-1, keepdims=True)
    xm = x - m
    logz = jnp.log(jnp.sum(jnp.exp(xm), axis=-1, keepdims=True))     # (TILE_N, 1)

    sum_xm = jnp.sum(xm, axis=-1, keepdims=True)                     # sum_c (x_c - m)
    col = jax.lax.broadcasted_iota(jnp.int32, xm.shape, 1)
    xm_t = jnp.sum(jnp.where(col == tgt, xm, 0.0), axis=-1, keepdims=True)

    # sum_c logp_c    = sum_xm - C * logz
    # logp[:, target] = xm_t - logz
    # row_loss = H(true_dist) - sum_c true_dist_c * logp_c
    row = (h_const
           - smooth * (sum_xm - c * logz)
           - (conf - smooth) * (xm_t - logz))

    if ignore_index > -1:
        # The ignore_index column carries 0 probability instead of `smooth`.
        xm_ig = jnp.sum(jnp.where(col == ignore_index, xm, 0.0),
                        axis=-1, keepdims=True)
        row = row + smooth * (xm_ig - logz)
        # Rows whose target is ignore_index contribute zero loss.
        row = jnp.where(tgt == ignore_index, 0.0, row)

    row_loss_ref[...] = row


def label_smoothing_loss(output, target, *, ignore_index, eps=0.1,
                         reduction="mean", tile_n=None):
    """Pallas TPU implementation of tensorfn.nn.LabelSmoothingLoss.forward."""
    n, c = output.shape
    target2d = target.astype(jnp.int32).reshape(n, 1)

    if tile_n is None:
        # ~8 MiB per logits tile (double-buffered by Pallas) keeps us inside the
        # default scoped-VMEM limit on all generations (v7x has only 64 MiB).
        budget = 8 * 1024 * 1024
        tile_n = max(8, min(128, budget // max(1, c * output.dtype.itemsize)))
        tile_n -= tile_n % 8
    tile_n = min(tile_n, n)

    grid = (pl.cdiv(n, tile_n),)

    kernel = functools.partial(
        _label_smoothing_kernel, eps=float(eps), ignore_index=int(ignore_index))

    row_loss = pl.pallas_call(
        kernel,
        out_shape=jax.ShapeDtypeStruct((n, 1), jnp.float32),
        grid=grid,
        in_specs=[
            pl.BlockSpec((tile_n, c), lambda i: (i, 0)),
            pl.BlockSpec((tile_n, 1), lambda i: (i, 0)),
        ],
        out_specs=pl.BlockSpec((tile_n, 1), lambda i: (i, 0)),
        compiler_params=pltpu.CompilerParams(
            dimension_semantics=("parallel",)),
    )(output, target2d)

    row_loss = row_loss[:, 0]
    if reduction == "none":
        return row_loss

    total = jnp.sum(row_loss)
    if reduction == "sum":
        return total

    # 'mean': divide by the number of non-ignored rows (PyTorch semantics).
    # NOTE: if every target equals ignore_index this divides by zero (NaN),
    # which matches the original PyTorch module's behavior.
    if ignore_index > -1:
        valid = jnp.sum((target != ignore_index).astype(jnp.float32))
    else:
        valid = jnp.float32(n)
    return total / valid


def _reference(output, target, *, ignore_index, eps=0.1, reduction="mean"):
    # Pure-JAX mirror of the PyTorch forward, for correctness checking only.
    n, c = output.shape
    logp = jax.nn.log_softmax(output.astype(jnp.float32), axis=-1)
    n_smooth = c - 1 if ignore_index > -1 else c
    smooth = eps / n_smooth
    true_dist = jnp.full((n, c), smooth, jnp.float32)
    true_dist = true_dist.at[jnp.arange(n), target].set(1.0 - eps + smooth)
    if ignore_index > -1:
        true_dist = true_dist.at[:, ignore_index].set(0.0)
        pad = target == ignore_index
        true_dist = jnp.where(pad[:, None], 0.0, true_dist)
    kl = jnp.where(true_dist > 0, true_dist * (jnp.log(true_dist) - logp), 0.0)
    if reduction == "none":
        return kl.sum(-1)
    loss = kl.sum()
    if reduction == "mean":
        denom = (n - pad.sum()) if ignore_index > -1 else n
        loss = loss / denom
    return loss


if __name__ == "__main__":
    key = jax.random.PRNGKey(0)
    k1, k2, k3, k4 = jax.random.split(key, 4)

    # Test 1: small, ignore_index active, all reductions.
    N, C = 16, 32
    ignore_index = 0
    eps = 0.1
    logits = jax.random.normal(k1, (N, C), dtype=jnp.float32)
    target = jax.random.randint(k2, (N,), 0, C, dtype=jnp.int32)
    target = target.at[0].set(ignore_index)   # guarantee at least one padded row

    for red in ("mean", "sum", "none"):
        got = jax.block_until_ready(
            label_smoothing_loss(logits, target, ignore_index=ignore_index,
                                 eps=eps, reduction=red))
        ref = _reference(logits, target, ignore_index=ignore_index,
                         eps=eps, reduction=red)
        assert jnp.allclose(got, ref, rtol=1e-5, atol=1e-5), (red, got, ref)

    # Test 2: larger, multi-tile grid (exercises the N-axis pipeline), no ignore.
    N2, C2 = 256, 512
    logits2 = jax.random.normal(k3, (N2, C2), dtype=jnp.float32)
    target2 = jax.random.randint(k4, (N2,), 0, C2, dtype=jnp.int32)
    got2 = jax.block_until_ready(
        label_smoothing_loss(logits2, target2, ignore_index=-1,
                             eps=0.2, reduction="mean", tile_n=64))
    ref2 = _reference(logits2, target2, ignore_index=-1, eps=0.2, reduction="mean")
    assert jnp.allclose(got2, ref2, rtol=1e-5, atol=1e-5), (got2, ref2)

    print("KERNEL_OK")
</pallas_src>

<mosaic_0001>
module attributes {stable_mosaic.version = 11 : i64} {
  func.func @_label_smoothing_kernel(%arg0: i32, %arg1: memref<16x32xf32, #tpu.memory_space<vmem>>, %arg2: memref<16x1xi32, #tpu.memory_space<vmem>>, %arg3: memref<16x1xf32, #tpu.memory_space<vmem>>) attributes {dimension_semantics = [#tpu.dimension_semantics<parallel>], iteration_bounds = array<i64: 1>, scalar_prefetch = 0 : i64, scratch_operands = 0 : i64, tpu.core_type = #tpu.core_type<tc>, window_params = [{transform_indices = @transform_0, window_bounds = array<i64: 16, 32>}, {transform_indices = @transform_1, window_bounds = array<i64: 16, 1>}, {transform_indices = @transform_2, window_bounds = array<i64: 16, 1>}]} {
    %c0 = arith.constant 0 : index
    %c0_0 = arith.constant 0 : index
    %0 = vector.load %arg1[%c0, %c0_0] : memref<16x32xf32, #tpu.memory_space<vmem>>, vector<16x32xf32>
    %c0_1 = arith.constant 0 : index
    %c0_2 = arith.constant 0 : index
    %1 = vector.load %arg2[%c0_1, %c0_2] : memref<16x1xi32, #tpu.memory_space<vmem>>, vector<16x1xi32>
    %cst = arith.constant dense<0xFF800000> : vector<16xf32>
    %2 = vector.multi_reduction <maximumf>, %0, %cst [1] : vector<16x32xf32> to vector<16xf32>
    %3 = vector.shape_cast %2 : vector<16xf32> to vector<16x1xf32>
    %4 = vector.broadcast %3 : vector<16x1xf32> to vector<16x32xf32>
    %5 = arith.subf %0, %4 : vector<16x32xf32>
    %6 = math.exp %5 : vector<16x32xf32>
    %cst_3 = arith.constant dense<0.000000e+00> : vector<16xf32>
    %7 = vector.multi_reduction <add>, %6, %cst_3 [1] : vector<16x32xf32> to vector<16xf32>
    %8 = vector.shape_cast %7 : vector<16xf32> to vector<16x1xf32>
    %9 = math.log %8 : vector<16x1xf32>
    %cst_4 = arith.constant dense<0.000000e+00> : vector<16xf32>
    %10 = vector.multi_reduction <add>, %5, %cst_4 [1] : vector<16x32xf32> to vector<16xf32>
    %11 = vector.shape_cast %10 : vector<16xf32> to vector<16x1xf32>
    %12 = tpu.iota {dimensions = array<i32: 1>} : vector<16x32xi32>
    %13 = vector.broadcast %1 : vector<16x1xi32> to vector<16x32xi32>
    %14 = arith.cmpi eq, %12, %13 : vector<16x32xi32>
    %cst_5 = arith.constant 0.000000e+00 : f32
    %15 = vector.broadcast %cst_5 : f32 to vector<16x32xf32>
    %16 = arith.select %14, %5, %15 : vector<16x32xi1>, vector<16x32xf32>
    %cst_6 = arith.constant dense<0.000000e+00> : vector<16xf32>
    %17 = vector.multi_reduction <add>, %16, %cst_6 [1] : vector<16x32xf32> to vector<16xf32>
    %18 = vector.shape_cast %17 : vector<16xf32> to vector<16x1xf32>
    %cst_7 = arith.constant 3.200000e+01 : f32
    %19 = vector.broadcast %cst_7 : f32 to vector<16x1xf32>
    %20 = arith.mulf %19, %9 : vector<16x1xf32>
    %21 = arith.subf %11, %20 : vector<16x1xf32>
    %cst_8 = arith.constant 0.0032258064 : f32
    %22 = vector.broadcast %cst_8 : f32 to vector<16x1xf32>
    %23 = arith.mulf %22, %21 : vector<16x1xf32>
    %cst_9 = arith.constant -0.647084891 : f32
    %24 = vector.broadcast %cst_9 : f32 to vector<16x1xf32>
    %25 = arith.subf %24, %23 : vector<16x1xf32>
    %26 = arith.subf %18, %9 : vector<16x1xf32>
    %cst_10 = arith.constant 0.899999976 : f32
    %27 = vector.broadcast %cst_10 : f32 to vector<16x1xf32>
    %28 = arith.mulf %27, %26 : vector<16x1xf32>
    %29 = arith.subf %25, %28 : vector<16x1xf32>
    %c0_i32 = arith.constant 0 : i32
    %30 = vector.broadcast %c0_i32 : i32 to vector<16x32xi32>
    %31 = arith.cmpi eq, %12, %30 : vector<16x32xi32>
    %cst_11 = arith.constant 0.000000e+00 : f32
    %32 = vector.broadcast %cst_11 : f32 to vector<16x32xf32>
    %33 = arith.select %31, %5, %32 : vector<16x32xi1>, vector<16x32xf32>
    %cst_12 = arith.constant dense<0.000000e+00> : vector<16xf32>
    %34 = vector.multi_reduction <add>, %33, %cst_12 [1] : vector<16x32xf32> to vector<16xf32>
    %35 = vector.shape_cast %34 : vector<16xf32> to vector<16x1xf32>
    %36 = arith.subf %35, %9 : vector<16x1xf32>
    %cst_13 = arith.constant 0.0032258064 : f32
    %37 = vector.broadcast %cst_13 : f32 to vector<16x1xf32>
    %38 = arith.mulf %37, %36 : vector<16x1xf32>
    %39 = arith.addf %29, %38 : vector<16x1xf32>
    %c0_i32_14 = arith.constant 0 : i32
    %40 = vector.broadcast %c0_i32_14 : i32 to vector<16x1xi32>
    %41 = arith.cmpi eq, %1, %40 : vector<16x1xi32>
    %cst_15 = arith.constant 0.000000e+00 : f32
    %42 = vector.broadcast %cst_15 : f32 to vector<16x1xf32>
    %43 = arith.select %41, %42, %39 : vector<16x1xi1>, vector<16x1xf32>
    %c0_16 = arith.constant 0 : index
    %c0_17 = arith.constant 0 : index
    %44 = vector.load %arg3[%c0_16, %c0_17] : memref<16x1xf32, #tpu.memory_space<vmem>>, vector<16x1xf32>
    tpu.vector_store %arg3[%c0_16, %c0_17], %43 {strides = array<i32>} : memref<16x1xf32, #tpu.memory_space<vmem>>, vector<16x1xf32>,
    return
  }
  func.func @transform_0(%arg0: i32) -> (i32, i32) {
    %c0_i32 = arith.constant 0 : i32
    %c0_i32_0 = arith.constant 0 : i32
    return %arg0, %c0_i32 : i32, i32
  }
  func.func @transform_1(%arg0: i32) -> (i32, i32) {
    %c0_i32 = arith.constant 0 : i32
    %c0_i32_0 = arith.constant 0 : i32
    return %arg0, %c0_i32 : i32, i32
  }
  func.func @transform_2(%arg0: i32) -> (i32, i32) {
    %c0_i32 = arith.constant 0 : i32
    %c0_i32_0 = arith.constant 0 : i32
    return %arg0, %c0_i32 : i32, i32
  }
}

</mosaic_0001>

<bundles_post_ra>
// kernel: tpu_custom_call.1
= control target key start
LH: loop header
LB: loop body
LE: loop exit
PB: predicated region body
PF: predicated region fallthrough
CT: control target
= control target key end

     0   :  { %vm15_vm0 = vcmask 261120   ;;  %v113_v2 = vmov 0   ;;  %v44_v13 = vlaneseq  ;;  %vm95_vm5 = vcmask 7168   ;;  %s165_s0 = inlined_call_operand.vmem [shape: f32[16,32], index: 0, kind: input, shape index: {}]   ;;  %s166_s1 = inlined_call_operand.vmem [shape: s32[16,1], index: 1, kind: input, shape index: {}]   ;;  %s167_s2 = inlined_call_operand.vmem [shape: f32[16,1], index: 2, kind: output, shape index: {}]  }
   0x1   :  { %v11_v0 = vld [vmem:[%s165_s0] sm:$0xff]  ;;  %v12_v1 = vld [vmem:[%s165_s0 + $0x8] sm:$0xff]  ;;  %103 = vset.pattern.permute.xlu1 %v113_v2  ;;  %104 = vset.pattern.permute.xlu0 %v113_v2 }
   0x2   :  { %v138_v3 = vld [vmem:[%s166_s1] sm:$0xff]  ;;  %v16_v4 = vsel %vm15_vm0, %v11_v0, -inf  ;;  %v145_v5 = vld [vmem:[%s166_s1 + $0x8] sm:$0xff]  ;;  %v19_v6 = vsel %vm15_vm0, %v12_v1, -inf  ;;  %v45_v17 = vand.u32 127, %v44_v13 }
   0x3   :  { %47 = vperm.xlu1 %103, %v138_v3   ;;  %17 = vmax.xlane.f32.xlu0 %v16_v4  ;;  %vm91_vm4 = vcmp.eq.s32.totalorder %v138_v3, 0  ;;  %vm92_vm6 = vcmp.eq.s32.totalorder %v145_v5, 0 }
   0x4   :  { %vm76_vm3 = vcmp.eq.s32.totalorder %v45_v17, 0 }
   0x7   :  { %50 = vperm.xlu1 %103, %v145_v5   ;;  %20 = vmax.xlane.f32.xlu0 %v19_v6 }
  0x7e   :  { %v48_v16 = vpop.permute.xlu1 %47 }
  0x7f   :  { %vm52_vm1 = vcmp.eq.s32.totalorder %v45_v17, %v48_v16 }
  0x82   :  { %v51_v21 = vpop.permute.xlu1 %50 }
  0x83   :  { %vm53_vm2 = vcmp.eq.s32.totalorder %v45_v17, %v51_v21 }
  0x8c   :  { %v18_v7 = vpop.xlane.xlu0 %17 }
  0x8d   :  { %v22_v8 = vsub.f32 %v11_v0, %v18_v7 }
  0x8f   :  { %v24_v9 = vmul.f32 1.442695, %v22_v8  ;;  %v38_v19 = vsel %vm15_vm0, %v22_v8, 0.0  ;;  %v54_v23 = vsel %vm52_vm1, %v22_v8, 0.0  ;;  %v77_v27 = vsel %vm76_vm3, %v22_v8, 0.0 }
  0x90   :  { %v21_v10 = vpop.xlane.xlu0 %20  ;;  %v56_v24 = vsel %vm15_vm0, %v54_v23, 0.0  ;;  %v79_v28 = vsel %vm15_vm0, %v77_v27, 0.0 }
  0x91   :  { %105 = vpow2.f32 %v24_v9  ;;  %v23_v11 = vsub.f32 %v12_v1, %v21_v10 }
  0x93   :  { %v26_v12 = vmul.f32 1.442695, %v23_v11  ;;  %v41_v22 = vsel %vm15_vm0, %v23_v11, 0.0  ;;  %v55_v25 = vsel %vm53_vm2, %v23_v11, 0.0  ;;  %v78_v29 = vsel %vm76_vm3, %v23_v11, 0.0 }
  0x94   :  { %v59_v26 = vsel %vm15_vm0, %v55_v25, 0.0  ;;  %v82_v30 = vsel %vm15_vm0, %v78_v29, 0.0 }
  0x95   :  { %107 = vpow2.f32 %v26_v12 }
  0x9e   :  { %v106_v14 = vpop.eup %105 }
  0x9f   :  { %v28_v15 = vsel %vm15_vm0, %v106_v14, 0.0 }
  0xa0   :  { %29 = vadd.xlane.f32.xlu0 %v28_v15 }
  0xa2   :  { %v108_v18 = vpop.eup %107 }
  0xa3   :  { %v31_v20 = vsel %vm15_vm0, %v108_v18, 0.0 }
  0xa4   :  { %39 = vadd.xlane.f32.xlu0 %v38_v19  ;;  %32 = vadd.xlane.f32.xlu1 %v31_v20 }
  0xa8   :  { %42 = vadd.xlane.f32.xlu0 %v41_v22 }
  0xac   :  { %57 = vadd.xlane.f32.xlu0 %v56_v24 }
  0xb0   :  { %60 = vadd.xlane.f32.xlu0 %v59_v26 }
  0xb4   :  { %80 = vadd.xlane.f32.xlu0 %v79_v28 }
  0xb8   :  { %83 = vadd.xlane.f32.xlu0 %v82_v30 }
 0x129   :  { %v30_v31 = vpop.xlane.xlu0 %29 }
 0x12a   :  { %109 = vlog2.f32 %v30_v31 }
 0x12d   :  { %v33_v32 = vpop.xlane.xlu1 %32  ;;  %v40_v33 = vpop.xlane.xlu0 %39 }
 0x12e   :  { %111 = vlog2.f32 %v33_v32 }
 0x131   :  { %v43_v34 = vpop.xlane.xlu0 %42 }
 0x135   :  { %v58_v35 = vpop.xlane.xlu0 %57 }
 0x137   :  { %v110_v36 = vpop.eup %109 }
 0x138   :  { %v35_v37 = vmul.f32 0.6931472, %v110_v36 }
 0x139   :  { %v61_v38 = vpop.xlane.xlu0 %60 }
 0x13a   :  { %v62_v39 = vmul.f32 32.0, %v35_v37  ;;  %v70_v43 = vsub.f32 %v58_v35, %v35_v37 }
 0x13b   :  { %v112_v40 = vpop.eup %111 }
 0x13c   :  { %v37_v41 = vmul.f32 0.6931472, %v112_v40  ;;  %v64_v42 = vsub.f32 %v40_v33, %v62_v39  ;;  %v72_v50 = vmul.f32 0.9, %v70_v43 }
 0x13d   :  { %v81_v44 = vpop.xlane.xlu0 %80 }
 0x13e   :  { %v66_v45 = vmul.f32 0.0032258064, %v64_v42  ;;  %v63_v46 = vmul.f32 32.0, %v37_v41  ;;  %v85_v47 = vsub.f32 %v81_v44, %v35_v37  ;;  %v71_v51 = vsub.f32 %v61_v38, %v37_v41 }
 0x140   :  { %v68_v48 = vsub.f32 -0.6470849, %v66_v45  ;;  %v65_v49 = vsub.f32 %v43_v34, %v63_v46  ;;  %v87_v55 = vmul.f32 0.0032258064, %v85_v47  ;;  %v73_v58 = vmul.f32 0.9, %v71_v51 }
 0x141   :  { %v84_v52 = vpop.xlane.xlu0 %83 }
 0x142   :  { %v67_v53 = vmul.f32 0.0032258064, %v65_v49  ;;  %v74_v54 = vsub.f32 %v68_v48, %v72_v50  ;;  %v86_v56 = vsub.f32 %v84_v52, %v37_v41 }
 0x144   :  { %v69_v57 = vsub.f32 -0.6470849, %v67_v53  ;;  %v89_v59 = vadd.f32 %v87_v55, %v74_v54  ;;  %v88_v62 = vmul.f32 0.0032258064, %v86_v56 }
 0x146   :  { %v75_v60 = vsub.f32 %v69_v57, %v73_v58  ;;  %v93_v61 = vsel %vm91_vm4, 0.0, %v89_v59 }
 0x147   :  { %96 = vst.msk [vmem:[%s167_s2] sm:$0xff] %vm95_vm5, %v93_v61 }
 0x148   :  { %v90_v63 = vadd.f32 %v88_v62, %v75_v60 }
 0x14a   :  { %v94_v0 = vsel %vm92_vm6, 0.0, %v90_v63 }
 0x14b   :  { %97 = vst.msk [vmem:[%s167_s2 + $0x8] sm:$0xff] %vm95_vm5, %v94_v0 }

</bundles_post_ra>
